<compile_context>
chip_gen: v7x
topology: tpu7x:2x2x1
jax: 0.10.0
libtpu: 0.0.40
codegen_flags: <defaults>
</compile_context>

<pallas_src>
import jax
import jax.numpy as jnp
from jax.experimental import pallas as pl
from jax.experimental.pallas import tpu as pltpu


def _make_dvn_kernel(obs_dim, hid, chunk, n_chunks, compute_dtype):
    """Builds the kernel body for one (obs_dim, bt) -> (1, bt) batch tile."""

    def kernel(x_ref, w1_ref, b1_ref, w2_ref, b2_ref, out_ref):
        # x_ref : (obs_dim, bt) VMEM      w1_ref: (hid, obs_dim) VMEM (resident)
        # b1_ref: (hid, 1) VMEM           w2_ref: (hid, 1) VMEM
        # b2_ref: (1,) SMEM scalar        out   : (1, bt) VMEM (lane-dense)
        w1 = w1_ref[...].astype(compute_dtype)
        b1 = b1_ref[...].astype(compute_dtype)
        w2 = w2_ref[...].astype(compute_dtype)
        b2 = b2_ref[0]  # f32 scalar from SMEM

        # Loop-invariant lane-broadcasts, hoisted out of the chunk loop.
        w1_cols = [
            jnp.broadcast_to(w1[:, k:k + 1], (hid, chunk)) for k in range(obs_dim)
        ]
        b1_b = jnp.broadcast_to(b1, (hid, chunk))
        w2_b = jnp.broadcast_to(w2, (hid, chunk))

        def compute(xc):
            # fc1 as outer-product accumulation on the VPU (K=4 would be >95%
            # MXU padding); xc rows broadcast along sublanes.
            acc = w1_cols[0] * xc[0:1, :]
            for k in range(1, obs_dim):
                acc = acc + w1_cols[k] * xc[k:k + 1, :]
            h = jnp.maximum(acc + b1_b, 0)                     # (hid, chunk)
            # fc2 (N=1): elementwise multiply + sublane (XLU) reduce, f32 accum.
            prod = (w2_b * h).astype(jnp.float32)
            return jnp.sum(prod, axis=0, keepdims=True) + b2   # (1, chunk) f32

        if n_chunks == 1:
            out_ref[...] = compute(x_ref[...].astype(compute_dtype))
        else:
            def body(c, carry):
                off = pl.multiple_of(c * chunk, chunk)
                xc = x_ref[:, pl.ds(off, chunk)].astype(compute_dtype)
                out_ref[:, pl.ds(off, chunk)] = compute(xc)
                return carry

            jax.lax.fori_loop(0, n_chunks, body, 0)

    return kernel


def dvn_forward_t(x_t, w1, b1, w2, b2, *, batch_tile=32768, chunk=512,
                  compute_dtype=jnp.float32):
    """Feature-major forward.  x_t: (obs_dim, B) f32  ->  (1, B) f32."""
    obs_dim, B = x_t.shape
    hid = w1.shape[0]

    if B <= chunk:
        # Single small block covering the full batch (block dims == array dims,
        # so no (8, 128) divisibility requirement).
        bt, chunk_eff, n_chunks = B, B, 1
    else:
        assert chunk % 128 == 0, "chunk must be a multiple of 128 lanes"
        # Batch tile: a multiple of `chunk` so the inner lane-chunk loop tiles
        # the block exactly; the last grid step may be a partial block (OOB
        # lanes read garbage and are masked out on store).
        bt = min(batch_tile, chunk * pl.cdiv(B, chunk))
        bt = max(chunk, (bt // chunk) * chunk)
        chunk_eff, n_chunks = chunk, bt // chunk
    n_tiles = pl.cdiv(B, bt)

    kernel = _make_dvn_kernel(obs_dim, hid, chunk_eff, n_chunks, compute_dtype)

    return pl.pallas_call(
        kernel,
        out_shape=jax.ShapeDtypeStruct((1, B), jnp.float32),
        grid=(n_tiles,),
        in_specs=[
            pl.BlockSpec((obs_dim, bt), lambda i: (0, i)),      # x: per-tile DMA
            pl.BlockSpec((hid, obs_dim), lambda i: (0, 0)),     # weights resident
            pl.BlockSpec((hid, 1), lambda i: (0, 0)),
            pl.BlockSpec((hid, 1), lambda i: (0, 0)),
            pl.BlockSpec(memory_space=pltpu.MemorySpace.SMEM),  # b2: SMEM scalar
        ],
        out_specs=pl.BlockSpec((1, bt), lambda i: (0, i)),
        compiler_params=pltpu.CompilerParams(
            dimension_semantics=("parallel",),  # v7x: shard batch tiles across TCs
            vmem_limit_bytes=32 * 1024 * 1024,
        ),
    )(x_t, w1, b1, w2, b2)


def dvn_forward(x, w1, b1, w2, b2, **kwargs):
    """PyTorch-layout forward.  x: (B, obs_dim) f32  ->  (B, 1) f32."""
    # Exactly one relayout pass (transpose); no zero-filled padding copy.
    # TODO(synk): keep observations feature-major upstream and call
    # dvn_forward_t directly to remove even this transpose.
    B = x.shape[0]
    out_t = dvn_forward_t(x.T, w1, b1, w2, b2, **kwargs)   # (1, B)
    return out_t.reshape(B, 1)


def init_params(key, obs_dim=4, hidden=32):
    # torch.nn.Linear-style init: U(-1/sqrt(fan_in), 1/sqrt(fan_in)).
    k1, k2, k3, k4 = jax.random.split(key, 4)
    lim1 = 1.0 / jnp.sqrt(jnp.float32(obs_dim))
    lim2 = 1.0 / jnp.sqrt(jnp.float32(hidden))
    # w1 in PyTorch layout (out_features, in_features); w2 stored as
    # (hidden, 1) (= fc2.weight.T); b1 as (hidden, 1); b2 as (1,) (= fc2.bias).
    w1 = jax.random.uniform(k1, (hidden, obs_dim), jnp.float32, -lim1, lim1)
    b1 = jax.random.uniform(k2, (hidden, 1), jnp.float32, -lim1, lim1)
    w2 = jax.random.uniform(k3, (hidden, 1), jnp.float32, -lim2, lim2)
    b2 = jax.random.uniform(k4, (1,), jnp.float32, -lim2, lim2)
    return w1, b1, w2, b2


def reference_forward(x, w1, b1, w2, b2):
    # HIGHEST precision so the f32 reference is not limited by MXU bf16 passes.
    hp = jax.lax.Precision.HIGHEST
    h = jnp.maximum(jnp.dot(x, w1.T, precision=hp) + b1.T, 0.0)
    return jnp.dot(h, w2, precision=hp) + b2


if __name__ == "__main__":
    key = jax.random.PRNGKey(0)
    k_x, k_x2, k_p = jax.random.split(key, 3)

    # CartPole-v1: observation_space.shape[0] == 4; hidden = 32.
    B, OBS, HID = 8, 4, 32
    w1, b1, w2, b2 = init_params(k_p, OBS, HID)

    # 1) Small rollout-sized batch (single-block path).
    x = jax.random.normal(k_x, (B, OBS), jnp.float32)
    out = jax.block_until_ready(dvn_forward(x, w1, b1, w2, b2))
    ref = reference_forward(x, w1, b1, w2, b2)
    assert out.shape == (B, 1)
    assert jnp.allclose(out, ref, atol=1e-5, rtol=1e-5)

    # 2) Larger ragged batch exercising the tiled path: 2-step grid, inner
    #    lane-chunk loop, partial (masked) last block, resident weights.
    B2 = 1664
    x2 = jax.random.normal(k_x2, (B2, OBS), jnp.float32)
    out2 = jax.block_until_ready(
        dvn_forward(x2, w1, b1, w2, b2, batch_tile=1024, chunk=512))
    ref2 = reference_forward(x2, w1, b1, w2, b2)
    assert out2.shape == (B2, 1)
    assert jnp.allclose(out2, ref2, atol=1e-5, rtol=1e-5)

    # 3) bf16 compute path (v6e/v7x VALU optimization) -- precision-changing,
    #    validated here against the f32 reference with loose tolerance.
    out2_bf16 = jax.block_until_ready(
        dvn_forward(x2, w1, b1, w2, b2, batch_tile=1024, chunk=512,
                    compute_dtype=jnp.bfloat16))
    assert jnp.allclose(out2_bf16, ref2, atol=1e-1, rtol=1e-1)

    print("KERNEL_OK")
</pallas_src>

<mosaic_0001>
module attributes {stable_mosaic.version = 11 : i64} {
  func.func @kernel(%arg0: i32, %arg1: memref<4x8xf32, #tpu.memory_space<vmem>>, %arg2: memref<32x4xf32, #tpu.memory_space<vmem>>, %arg3: memref<32x1xf32, #tpu.memory_space<vmem>>, %arg4: memref<32x1xf32, #tpu.memory_space<vmem>>, %arg5: memref<1xf32, #tpu.memory_space<smem>>, %arg6: memref<1x8xf32, #tpu.memory_space<vmem>>) attributes {dimension_semantics = [#tpu.dimension_semantics<parallel>], iteration_bounds = array<i64: 1>, scalar_prefetch = 0 : i64, scratch_operands = 0 : i64, tpu.core_type = #tpu.core_type<tc>, window_params = [{transform_indices = @transform_0, window_bounds = array<i64: 4, 8>}, {pipeline_mode = #tpu.pipeline_mode<synchronous>, transform_indices = @transform_1, window_bounds = array<i64: 32, 4>}, {pipeline_mode = #tpu.pipeline_mode<synchronous>, transform_indices = @transform_2, window_bounds = array<i64: 32, 1>}, {pipeline_mode = #tpu.pipeline_mode<synchronous>, transform_indices = @transform_3, window_bounds = array<i64: 32, 1>}, {transform_indices = @transform_4, window_bounds = array<i64: 1>}, {transform_indices = @transform_5, window_bounds = array<i64: 1, 8>}]} {
    %c0 = arith.constant 0 : index
    %c0_0 = arith.constant 0 : index
    %0 = vector.load %arg2[%c0, %c0_0] : memref<32x4xf32, #tpu.memory_space<vmem>>, vector<32x4xf32>
    %c0_1 = arith.constant 0 : index
    %c0_2 = arith.constant 0 : index
    %1 = vector.load %arg3[%c0_1, %c0_2] : memref<32x1xf32, #tpu.memory_space<vmem>>, vector<32x1xf32>
    %c0_3 = arith.constant 0 : index
    %c0_4 = arith.constant 0 : index
    %2 = vector.load %arg4[%c0_3, %c0_4] : memref<32x1xf32, #tpu.memory_space<vmem>>, vector<32x1xf32>
    %c0_5 = arith.constant 0 : index
    %3 = memref.load %arg5[%c0_5] : memref<1xf32, #tpu.memory_space<smem>>
    %4 = vector.extract_strided_slice %0 {offsets = [0, 0], sizes = [32, 1], strides = [1, 1]} : vector<32x4xf32> to vector<32x1xf32>
    %5 = vector.shape_cast %4 : vector<32x1xf32> to vector<32x1xf32>
    %6 = vector.broadcast %5 : vector<32x1xf32> to vector<32x8xf32>
    %7 = vector.extract_strided_slice %0 {offsets = [0, 1], sizes = [32, 1], strides = [1, 1]} : vector<32x4xf32> to vector<32x1xf32>
    %8 = vector.shape_cast %7 : vector<32x1xf32> to vector<32x1xf32>
    %9 = vector.broadcast %8 : vector<32x1xf32> to vector<32x8xf32>
    %10 = vector.extract_strided_slice %0 {offsets = [0, 2], sizes = [32, 1], strides = [1, 1]} : vector<32x4xf32> to vector<32x1xf32>
    %11 = vector.shape_cast %10 : vector<32x1xf32> to vector<32x1xf32>
    %12 = vector.broadcast %11 : vector<32x1xf32> to vector<32x8xf32>
    %13 = vector.extract_strided_slice %0 {offsets = [0, 3], sizes = [32, 1], strides = [1, 1]} : vector<32x4xf32> to vector<32x1xf32>
    %14 = vector.shape_cast %13 : vector<32x1xf32> to vector<32x1xf32>
    %15 = vector.broadcast %14 : vector<32x1xf32> to vector<32x8xf32>
    %16 = vector.shape_cast %1 : vector<32x1xf32> to vector<32x1xf32>
    %17 = vector.broadcast %16 : vector<32x1xf32> to vector<32x8xf32>
    %18 = vector.shape_cast %2 : vector<32x1xf32> to vector<32x1xf32>
    %19 = vector.broadcast %18 : vector<32x1xf32> to vector<32x8xf32>
    %c0_6 = arith.constant 0 : index
    %c0_7 = arith.constant 0 : index
    %20 = vector.load %arg1[%c0_6, %c0_7] : memref<4x8xf32, #tpu.memory_space<vmem>>, vector<4x8xf32>
    %21 = vector.extract_strided_slice %20 {offsets = [0, 0], sizes = [1, 8], strides = [1, 1]} : vector<4x8xf32> to vector<1x8xf32>
    %22 = vector.broadcast %21 : vector<1x8xf32> to vector<32x8xf32>
    %23 = arith.mulf %6, %22 : vector<32x8xf32>
    %24 = vector.extract_strided_slice %20 {offsets = [1, 0], sizes = [1, 8], strides = [1, 1]} : vector<4x8xf32> to vector<1x8xf32>
    %25 = vector.broadcast %24 : vector<1x8xf32> to vector<32x8xf32>
    %26 = arith.mulf %9, %25 : vector<32x8xf32>
    %27 = arith.addf %23, %26 : vector<32x8xf32>
    %28 = vector.extract_strided_slice %20 {offsets = [2, 0], sizes = [1, 8], strides = [1, 1]} : vector<4x8xf32> to vector<1x8xf32>
    %29 = vector.broadcast %28 : vector<1x8xf32> to vector<32x8xf32>
    %30 = arith.mulf %12, %29 : vector<32x8xf32>
    %31 = arith.addf %27, %30 : vector<32x8xf32>
    %32 = vector.extract_strided_slice %20 {offsets = [3, 0], sizes = [1, 8], strides = [1, 1]} : vector<4x8xf32> to vector<1x8xf32>
    %33 = vector.broadcast %32 : vector<1x8xf32> to vector<32x8xf32>
    %34 = arith.mulf %15, %33 : vector<32x8xf32>
    %35 = arith.addf %31, %34 : vector<32x8xf32>
    %36 = arith.addf %35, %17 : vector<32x8xf32>
    %cst = arith.constant 0.000000e+00 : f32
    %37 = vector.broadcast %cst : f32 to vector<32x8xf32>
    %38 = arith.maximumf %36, %37 : vector<32x8xf32>
    %39 = arith.mulf %19, %38 : vector<32x8xf32>
    %cst_8 = arith.constant dense<0.000000e+00> : vector<8xf32>
    %40 = vector.multi_reduction <add>, %39, %cst_8 [0] : vector<32x8xf32> to vector<8xf32>
    %41 = vector.shape_cast %40 : vector<8xf32> to vector<1x8xf32>
    %42 = vector.broadcast %3 : f32 to vector<1x8xf32>
    %43 = arith.addf %41, %42 : vector<1x8xf32>
    %c0_9 = arith.constant 0 : index
    %c0_10 = arith.constant 0 : index
    %44 = vector.load %arg6[%c0_9, %c0_10] : memref<1x8xf32, #tpu.memory_space<vmem>>, vector<1x8xf32>
    tpu.vector_store %arg6[%c0_9, %c0_10], %43 {strides = array<i32>} : memref<1x8xf32, #tpu.memory_space<vmem>>, vector<1x8xf32>,
    return
  }
  func.func @transform_0(%arg0: i32) -> (i32, i32) {
    %c0_i32 = arith.constant 0 : i32
    %c0_i32_0 = arith.constant 0 : i32
    return %c0_i32, %arg0 : i32, i32
  }
  func.func @transform_1(%arg0: i32) -> (i32, i32) {
    %c0_i32 = arith.constant 0 : i32
    %c0_i32_0 = arith.constant 0 : i32
    %c0_i32_1 = arith.constant 0 : i32
    return %c0_i32, %c0_i32_0 : i32, i32
  }
  func.func @transform_2(%arg0: i32) -> (i32, i32) {
    %c0_i32 = arith.constant 0 : i32
    %c0_i32_0 = arith.constant 0 : i32
    %c0_i32_1 = arith.constant 0 : i32
    return %c0_i32, %c0_i32_0 : i32, i32
  }
  func.func @transform_3(%arg0: i32) -> (i32, i32) {
    %c0_i32 = arith.constant 0 : i32
    %c0_i32_0 = arith.constant 0 : i32
    %c0_i32_1 = arith.constant 0 : i32
    return %c0_i32, %c0_i32_0 : i32, i32
  }
  func.func @transform_4(%arg0: i32) -> i32 {
    %c0_i32 = arith.constant 0 : i32
    %c0_i32_0 = arith.constant 0 : i32
    return %c0_i32 : i32
  }
  func.func @transform_5(%arg0: i32) -> (i32, i32) {
    %c0_i32 = arith.constant 0 : i32
    %c0_i32_0 = arith.constant 0 : i32
    return %c0_i32, %arg0 : i32, i32
  }
}

</mosaic_0001>

<bundles_post_ra>
// kernel: tpu_custom_call.1
= control target key start
LH: loop header
LB: loop body
LE: loop exit
PB: predicated region body
PF: predicated region fallthrough
CT: control target
= control target key end

     0   :  { %v273_v1 = vmov 2   ;;  %v274_v2 = vmov 1   ;;  %s362_s0 = inlined_call_operand.vmem [shape: f32[4,8], index: 0, kind: input, shape index: {}]   ;;  %s363_s1 = inlined_call_operand.vmem [shape: f32[32,4], index: 1, kind: input, shape index: {}]   ;;  %s364_s2 = inlined_call_operand.vmem [shape: f32[32,1], index: 2, kind: input, shape index: {}]   ;;  %s365_s3 = inlined_call_operand.vmem [shape: f32[32,1], index: 3, kind: input, shape index: {}]   ;;  %s366_s4 = inlined_call_operand.<no memory space> [shape: f32[1], index: 4, kind: input, shape index: {}]   ;;  %s367_s5 = inlined_call_operand.hbm [shape: f32[1,8], index: 5, kind: output, shape index: {}]  }
   0x1   :  { %v22_v0 = vld [vmem:[%s363_s1] sm:$0xff]  ;;  %238 = vset.pattern.permute.xlu0 %v273_v1  ;;  %237 = vset.pattern.permute.xlu1 %v274_v2  ;;  %v23_v3 = vld [vmem:[%s363_s1 + $0x8] sm:$0xff]  ;;  %v25_v4 = vld [vmem:[%s363_s1 + $0x18] sm:$0xff] }
   0x2   :  { %72 = vperm.xlu0 %238, %v22_v0   ;;  %56 = vperm.xlu1 %237, %v22_v0  }
   0x3   :  { %11 = vsyncpa [#allocation4], 0  ;;  %v24_v5 = vld [vmem:[%s363_s1 + $0x10] sm:$0xff]  ;;  %v275_v6 = vmov 3   ;;  %v276_v7 = vmov 0   ;;  %v27_v8 = vld [vmem:[%s364_s2 + $0x8] sm:$0xff]  ;;  %v144_v25 = vlaneseq }
   0x4   :  { %v30_v9 = vld [vmem:[%s365_s3] sm:$0xff]  ;;  %v32_v10 = vld [vmem:[%s365_s3 + $0x10] sm:$0xff]  ;;  %v29_v13 = vld [vmem:[%s364_s2 + $0x18] sm:$0xff]  ;;  %vm200_vm0 = vcmask 64512   ;;  %s277_s17 = smov [#allocation3]   ;;  %vm216_vm1 = vcmask 57344  }
   0x5   :  { %v26_v11 = vld [vmem:[%s364_s2] sm:$0xff]  ;;  %v28_v12 = vld [vmem:[%s364_s2 + $0x10] sm:$0xff]  ;;  %v31_v14 = vld [vmem:[%s365_s3 + $0x8] sm:$0xff]  ;;  %v145_v28 = vshrl.u32 %v144_v25, 7  ;;  %s224_s18 = sshll.u32 %s277_s17, 4  ;;  %s225_s18 = int_to_ptr.vmem [resolvable:$true] %s224_s18 }
   0x6   :  { %241 = vset.pattern.permute.xlu0 %v274_v2  ;;  %60 = vperm.xlu1 %237, %v23_v3   ;;  %v33_v15 = vld [vmem:[%s365_s3 + $0x18] sm:$0xff]  ;;  %v143_v33 = vld [vmem:[%s362_s0] sm:$0xf]  ;;  %s249_s19 = scalar_lea.vmem %s225_s18, 16  ;;  %s253_s20 = scalar_lea.vmem %s225_s18, 32 }
   0x7   :  { %68 = vperm.xlu0 %241, %v25_v4   ;;  %v146_v29 = vsub.s32 0, %v145_v28  ;;  %v154_v31 = vsub.s32 1, %v145_v28  ;;  %v166_v35 = vsub.s32 2, %v145_v28  ;;  %v178_v37 = vsub.s32 3, %v145_v28  ;;  %p250_p0 = scmp.ne.s32.totalorder %s225_s18, %s249_s19  ;;  %p254_p1 = scmp.lt.s32.totalorder %s225_s18, %s225_s18 }
   0x8   :  { %p255_p2 = scmp.lt.s32.totalorder %s253_s20, %s249_s19 }
   0x9   :  { %v147_v34 = vrot.slane %v143_v33, %v146_v29  ;;  %v155_v36 = vrot.slane %v143_v33, %v154_v31  ;;  %v167_v42 = vrot.slane %v143_v33, %v166_v35  ;;  %v179_v45 = vrot.slane %v143_v33, %v178_v37 }
   0xa   :  { %64 = vperm.xlu1 %237, %v24_v5   ;;  %p256_p3 = por %p255_p2, %p254_p1 }
   0xb   :  { %244 = vset.pattern.permute.xlu0 %v275_v6 }
   0xc   :  { %92 = vperm.xlu0 %244, %v23_v3   ;;  %p257_p4 = pnand %p256_p3, %p250_p0 }
   0xe   :  { %239 = vset.pattern.permute.xlu1 %v273_v1 }
   0xf   :  { %76 = vperm.xlu1 %239, %v23_v3  }
  0x10   :  { %100 = vperm.xlu0 %244, %v25_v4  }
  0x13   :  { %240 = vset.pattern.permute.xlu1 %v276_v7 }
  0x14   :  { %247 = vset.pattern.permute.xlu0 %v276_v7  ;;  %52 = vperm.xlu1 %240, %v25_v4  }
  0x15   :  { %37 = vperm.xlu0 %247, %v22_v0  }
  0x18   :  { %242 = vset.pattern.permute.xlu1 %v273_v1 }
  0x19   :  { %42 = vperm.xlu0 %247, %v23_v3   ;;  %80 = vperm.xlu1 %242, %v24_v5  }
  0x1d   :  { %47 = vperm.xlu0 %247, %v24_v5   ;;  %243 = vset.pattern.permute.xlu1 %v275_v6 }
  0x1e   :  { %88 = vperm.xlu1 %243, %v22_v0  }
  0x21   :  { %110 = vperm.xlu0 %247, %v27_v8  }
  0x22   :  { %245 = vset.pattern.permute.xlu1 %v273_v1 }
  0x23   :  { %84 = vperm.xlu1 %245, %v25_v4  }
  0x25   :  { %125 = vperm.xlu0 %247, %v30_v9  }
  0x27   :  { %246 = vset.pattern.permute.xlu1 %v275_v6 }
  0x28   :  { %96 = vperm.xlu1 %246, %v24_v5  }
  0x29   :  { %135 = vperm.xlu0 %247, %v32_v10  }
  0x2c   :  { %248 = vset.pattern.permute.xlu1 %v276_v7 }
  0x2d   :  { %105 = vperm.xlu1 %248, %v26_v11  }
  0x31   :  { %115 = vperm.xlu1 %248, %v28_v12  }
  0x35   :  { %120 = vperm.xlu1 %248, %v29_v13  }
  0x39   :  { %130 = vperm.xlu1 %248, %v31_v14  }
  0x3d   :  { %140 = vperm.xlu1 %248, %v33_v15  }
  0x81   :  { %v57_v16 = vpop.permute.xlu1 %56  ;;  %v73_v17 = vpop.permute.xlu0 %72 }
  0x82   :  { %v156_v43 = vmul.f32 %v155_v36, %v57_v16  ;;  %v168_v51 = vmul.f32 %v167_v42, %v73_v17 }
  0x85   :  { %v61_v18 = vpop.permute.xlu1 %60 }
  0x86   :  { %v69_v19 = vpop.permute.xlu0 %68  ;;  %v157_v44 = vmul.f32 %v155_v36, %v61_v18 }
  0x87   :  { %v159_v55 = vmul.f32 %v155_v36, %v69_v19 }
  0x89   :  { %v65_v20 = vpop.permute.xlu1 %64 }
  0x8a   :  { %v158_v47 = vmul.f32 %v155_v36, %v65_v20 }
  0x8b   :  { %v93_v21 = vpop.permute.xlu0 %92 }
  0x8c   :  { %v181_v56 = vmul.f32 %v179_v45, %v93_v21 }
  0x8e   :  { %v77_v22 = vpop.permute.xlu1 %76 }
  0x8f   :  { %v101_v23 = vpop.permute.xlu0 %100  ;;  %v169_v52 = vmul.f32 %v167_v42, %v77_v22 }
  0x90   :  { %v183_v11 = vmul.f32 %v179_v45, %v101_v23 }
  0x93   :  { %v53_v24 = vpop.permute.xlu1 %52 }
  0x94   :  { %v38_v26 = vpop.permute.xlu0 %37  ;;  %v151_v57 = vmul.f32 %v147_v34, %v53_v24 }
  0x95   :  { %v148_v40 = vmul.f32 %v147_v34, %v38_v26 }
  0x96   :  { %v163_v3 = vadd.f32 %v159_v55, %v151_v57 }
  0x97   :  { %v160_v48 = vadd.f32 %v156_v43, %v148_v40 }
  0x98   :  { %v81_v27 = vpop.permute.xlu1 %80  ;;  %v43_v30 = vpop.permute.xlu0 %42 }
  0x99   :  { %v149_v41 = vmul.f32 %v147_v34, %v43_v30  ;;  %v170_v58 = vmul.f32 %v167_v42, %v81_v27  ;;  %v172_v61 = vadd.f32 %v168_v51, %v160_v48 }
  0x9b   :  { %v161_v49 = vadd.f32 %v157_v44, %v149_v41 }
  0x9c   :  { %v48_v38 = vpop.permute.xlu0 %47 }
  0x9d   :  { %v89_v32 = vpop.permute.xlu1 %88  ;;  %v150_v46 = vmul.f32 %v147_v34, %v48_v38  ;;  %v173_v59 = vadd.f32 %v169_v52, %v161_v49 }
  0x9e   :  { %v180_v54 = vmul.f32 %v179_v45, %v89_v32 }
  0x9f   :  { %v162_v53 = vadd.f32 %v158_v47, %v150_v46  ;;  %v185_v4 = vadd.f32 %v181_v56, %v173_v59 }
  0xa0   :  { %v111_v62 = vpop.permute.xlu0 %110  ;;  %v184_v1 = vadd.f32 %v180_v54, %v172_v61 }
  0xa1   :  { %v174_v2 = vadd.f32 %v170_v58, %v162_v53  ;;  %v189_v12 = vadd.f32 %v185_v4, %v111_v62 }
  0xa2   :  { %v85_v39 = vpop.permute.xlu1 %84 }
  0xa3   :  { %v171_v0 = vmul.f32 %v167_v42, %v85_v39  ;;  %v193_v17 = vmax.f32 %v189_v12, 0.0  ;;  %v214_v39 = vstv %s366_s4 }
  0xa4   :  { %v126_v10 = vpop.permute.xlu0 %125 }
  0xa5   :  { %v175_v8 = vadd.f32 %v171_v0, %v163_v3 }
  0xa7   :  { %v97_v50 = vpop.permute.xlu1 %96  ;;  %v187_v16 = vadd.f32 %v183_v11, %v175_v8 }
  0xa8   :  { %v182_v60 = vmul.f32 %v179_v45, %v97_v50  ;;  %v136_v20 = vpop.permute.xlu0 %135 }
  0xaa   :  { %v186_v6 = vadd.f32 %v182_v60, %v174_v2 }
  0xac   :  { %v106_v63 = vpop.permute.xlu1 %105 }
  0xad   :  { %v188_v5 = vadd.f32 %v184_v1, %v106_v63 }
  0xaf   :  { %v192_v13 = vmax.f32 %v188_v5, 0.0 }
  0xb0   :  { %v116_v7 = vpop.permute.xlu1 %115 }
  0xb1   :  { %v190_v9 = vadd.f32 %v186_v6, %v116_v7  ;;  %v196_v18 = vmul.f32 %v192_v13, %v126_v10 }
  0xb3   :  { %v194_v15 = vmax.f32 %v190_v9, 0.0  ;;  %v201_v26 = vsel %vm200_vm0, %v196_v18, 0.0 }
  0xb4   :  { %v121_v14 = vpop.permute.xlu1 %120 }
  0xb5   :  { %v191_v19 = vadd.f32 %v187_v16, %v121_v14  ;;  %v198_v22 = vmul.f32 %v194_v15, %v136_v20 }
  0xb7   :  { %v195_v25 = vmax.f32 %v191_v19, 0.0  ;;  %v204_v30 = vsel %vm200_vm0, %v198_v22, 0.0 }
  0xb8   :  { %v131_v21 = vpop.permute.xlu1 %130 }
  0xb9   :  { %v197_v24 = vmul.f32 %v193_v17, %v131_v21 }
  0xbb   :  { %v202_v27 = vsel %vm200_vm0, %v197_v24, 0.0 }
  0xbc   :  { %v203_v28 = vadd.f32 %v202_v27, %v201_v26  ;;  %v141_v29 = vpop.permute.xlu1 %140 }
  0xbd   :  { %v199_v23 = vmul.f32 %v195_v25, %v141_v29 }
  0xbe   :  { %v205_v31 = vadd.f32 %v204_v30, %v203_v28 }
  0xbf   :  { %v206_v32 = vsel %vm200_vm0, %v199_v23, 0.0 }
  0xc0   :  { %v207_v33 = vadd.f32 %v206_v32, %v205_v31 }
  0xc2   :  { %v208_v34 = vrot.slane %v207_v33, 4 }
  0xc4   :  { %v209_v35 = vadd.f32 %v208_v34, %v207_v33 }
  0xc6   :  { %v210_v36 = vrot.slane %v209_v35, 2 }
  0xc8   :  { %v211_v37 = vadd.f32 %v210_v36, %v209_v35 }
  0xca   :  { %v212_v38 = vrot.slane %v211_v37, 1 }
  0xcc   :  { %v213_v40 = vadd.f32 %v212_v38, %v211_v37 }
  0xce   :  { %v215_v41 = vadd.f32 %v214_v39, %v213_v40 }
  0xd0   :  { %217 = vst.msk [vmem:[#allocation3] sm:$0x1] %vm216_vm1, %v215_v41 }
  0xd1   :  { %260 = shalt.err (!%p257_p4)
}
  0xd2   :  { %s261_s23 = scalar_lea.hbm %s367_s5, 16 }
  0xd3   :  { %p262_p5 = scmp.ne.s32.totalorder %s367_s5, %s261_s23  ;;  %p265_p6 = scmp.lt.u32.totalorder %s261_s23, %s367_s5 }
  0xd5   :  { %p267_p7 = pnand %p265_p6, %p262_p5 }
  0xd7   :  { %270 = shalt.err (!%p267_p7)
}
  0xd8   :  { %227 = dma.vmem_to_hbm [thread:$0]  %s225_s18, 16, %s367_s5, [#allocation4]  }
  0xd9   :  { %271 = dma.done.wait [#allocation4], 16  }
  0xda   :  { %272 = vsyncadd [#allocation4], 4294967280 }
  0xdb   :  { %231 = vsyncpa [#allocation4], 1 }

</bundles_post_ra>
